<compile_context>
chip_gen: v7x
topology: tpu7x:2x2x1
jax: 0.10.0
libtpu: 0.0.40
codegen_flags: <defaults>
</compile_context>

<pallas_src>
import math

import jax
import jax.numpy as jnp
from jax import lax
from jax.experimental import pallas as pl
from jax.experimental.pallas import tpu as pltpu

_LANE = 128
_SUBLANE = 8


def _round_up(x, m):
    return (x + m - 1) // m * m


# ----------------------------- linear kernels ------------------------------ #

def _linear_kernel(x_ref, w_ref, b_ref, o_ref):
    # x bf16 (tm, din_p), w bf16 (din_p, dout_p), b f32 (1, dout_p)
    o_ref[...] = (jnp.dot(x_ref[...], w_ref[...],
                          preferred_element_type=jnp.float32) + b_ref[...])


def _masked_linear_kernel(x_ref, m_ref, w_ref, b_ref, o_ref):
    # x f32 (tm, din_p), m f32 (tm, 1) of {0,1}, w bf16, b f32
    x = (x_ref[...] * m_ref[...]).astype(jnp.bfloat16)
    o_ref[...] = (jnp.dot(x, w_ref[...],
                          preferred_element_type=jnp.float32) + b_ref[...])


def linear(x, w, b, *, max_block_rows=256):
    """y = x @ w + b. Row-tiled, lane-padded, bf16 MXU / f32 accumulation."""
    n, din = x.shape
    dout = w.shape[1]
    din_p = _round_up(din, _LANE)
    dout_p = _round_up(dout, _LANE)
    n8 = _round_up(n, _SUBLANE)
    tm = min(max_block_rows, n8)
    n_p = _round_up(n8, tm)

    xp = jnp.pad(x.astype(jnp.bfloat16), ((0, n_p - n), (0, din_p - din)))
    wp = jnp.pad(w, ((0, din_p - din), (0, dout_p - dout))).astype(jnp.bfloat16)
    bp = jnp.pad(b.astype(jnp.float32), (0, dout_p - dout)).reshape(1, dout_p)

    out = pl.pallas_call(
        _linear_kernel,
        out_shape=jax.ShapeDtypeStruct((n_p, dout_p), jnp.float32),
        grid=(n_p // tm,),
        in_specs=[pl.BlockSpec((tm, din_p), lambda i: (i, 0)),
                  pl.BlockSpec((din_p, dout_p), lambda i: (0, 0)),
                  pl.BlockSpec((1, dout_p), lambda i: (0, 0))],
        out_specs=pl.BlockSpec((tm, dout_p), lambda i: (i, 0)),
        compiler_params=pltpu.CompilerParams(
            dimension_semantics=("parallel",)),
    )(xp, wp, bp)
    return out[:n, :dout]


def masked_linear(x, m, w, b, *, max_block_rows=256):
    """y = (x * m) @ w + b with per-row {0,1} mask m of shape (n, 1)."""
    n, din = x.shape
    dout = w.shape[1]
    din_p = _round_up(din, _LANE)
    dout_p = _round_up(dout, _LANE)
    n8 = _round_up(n, _SUBLANE)
    tm = min(max_block_rows, n8)
    n_p = _round_up(n8, tm)

    xp = jnp.pad(x.astype(jnp.float32), ((0, n_p - n), (0, din_p - din)))
    mp = jnp.pad(m.astype(jnp.float32), ((0, n_p - n), (0, 0)))
    wp = jnp.pad(w, ((0, din_p - din), (0, dout_p - dout))).astype(jnp.bfloat16)
    bp = jnp.pad(b.astype(jnp.float32), (0, dout_p - dout)).reshape(1, dout_p)

    out = pl.pallas_call(
        _masked_linear_kernel,
        out_shape=jax.ShapeDtypeStruct((n_p, dout_p), jnp.float32),
        grid=(n_p // tm,),
        in_specs=[pl.BlockSpec((tm, din_p), lambda i: (i, 0)),
                  pl.BlockSpec((tm, 1), lambda i: (i, 0)),
                  pl.BlockSpec((din_p, dout_p), lambda i: (0, 0)),
                  pl.BlockSpec((1, dout_p), lambda i: (0, 0))],
        out_specs=pl.BlockSpec((tm, dout_p), lambda i: (i, 0)),
        compiler_params=pltpu.CompilerParams(
            dimension_semantics=("parallel",)),
    )(xp, mp, wp, bp)
    return out[:n, :dout]


# ------------------- fused bidirectional LSTM recurrence -------------------- #

def _bilstm_rec_kernel(gx_ref, len_ref, whh_ref, of_ref, ob_ref, h_sc, c_sc):
    # gx_ref : (T, B, 8*Hp) f32   precomputed x@Wih + b for [fwd | bwd] gates
    # len_ref: (B, 1) int32       per-row valid length
    # whh_ref: (2*Hp, 8*Hp) bf16  block-diag [Whh_f 0; 0 Whh_b]
    # of_ref : (T, B, Hp) f32     forward-direction hidden outputs
    # ob_ref : (T, B, Hp) f32     backward-direction hidden outputs
    # h_sc/c_sc: (B, 2*Hp) f32    concatenated [fwd | bwd] state
    T = gx_ref.shape[0]
    Hp = of_ref.shape[2]
    G = 4 * Hp

    h_sc[...] = jnp.zeros_like(h_sc)
    c_sc[...] = jnp.zeros_like(c_sc)
    lens = len_ref[...]                                  # (B, 1) int32

    def gate_update(gates, c_prev):
        # PyTorch gate order: i, f, g, o — each block Hp lanes (128-aligned).
        i_g = jax.nn.sigmoid(gates[:, 0 * Hp:1 * Hp])
        f_g = jax.nn.sigmoid(gates[:, 1 * Hp:2 * Hp])
        g_g = jnp.tanh(gates[:, 2 * Hp:3 * Hp])
        o_g = jax.nn.sigmoid(gates[:, 3 * Hp:4 * Hp])
        c_new = f_g * c_prev + i_g * g_g
        h_new = o_g * jnp.tanh(c_new)
        return h_new, c_new

    def step(s, carry):
        tb = T - 1 - s                                   # reversed time index
        h_old = h_sc[...]                                # (B, 2Hp)
        c_old = c_sc[...]
        # one combined recurrent MXU push for both directions
        rec = jnp.dot(h_old.astype(jnp.bfloat16), whh_ref[...],
                      preferred_element_type=jnp.float32)        # (B, 8Hp)
        gates_f = gx_ref[s][:, :G] + rec[:, :G]
        gates_b = gx_ref[tb][:, G:] + rec[:, G:]

        hf_new, cf_new = gate_update(gates_f, c_old[:, :Hp])
        hb_new, cb_new = gate_update(gates_b, c_old[:, Hp:])

        mask_f = s < lens                                # (B, 1) bool
        mask_b = tb < lens                               # backward dir starts
                                                         # at t = len-1 (state
                                                         # stays 0 before that)
        h_sc[:, :Hp] = jnp.where(mask_f, hf_new, h_old[:, :Hp])
        c_sc[:, :Hp] = jnp.where(mask_f, cf_new, c_old[:, :Hp])
        h_sc[:, Hp:] = jnp.where(mask_b, hb_new, h_old[:, Hp:])
        c_sc[:, Hp:] = jnp.where(mask_b, cb_new, c_old[:, Hp:])

        of_ref[s] = jnp.where(mask_f, hf_new, 0.0)       # padded steps -> 0
        ob_ref[tb] = jnp.where(mask_b, hb_new, 0.0)
        return carry

    lax.fori_loop(0, T, step, 0)


def _bilstm_rec(gx_tbg, lens, whh_bf16, Hp):
    # gx_tbg: (T, B, 8*Hp) f32, lens: (B,) int32, whh: (2Hp, 8Hp) bf16
    # TODO(synk): for long sequences, stream the time axis with a chunked grid
    # instead of loading the whole (T, B, 8Hp) slab; not needed at demo sizes.
    T, B, G8 = gx_tbg.shape
    o_f, o_b = pl.pallas_call(
        _bilstm_rec_kernel,
        out_shape=(jax.ShapeDtypeStruct((T, B, Hp), jnp.float32),
                   jax.ShapeDtypeStruct((T, B, Hp), jnp.float32)),
        grid=(1,),
        in_specs=[pl.BlockSpec((T, B, G8), lambda i: (0, 0, 0)),
                  pl.BlockSpec((B, 1), lambda i: (0, 0)),
                  pl.BlockSpec((2 * Hp, G8), lambda i: (0, 0))],
        out_specs=(pl.BlockSpec((T, B, Hp), lambda i: (0, 0, 0)),
                   pl.BlockSpec((T, B, Hp), lambda i: (0, 0, 0))),
        scratch_shapes=[pltpu.VMEM((B, 2 * Hp), jnp.float32),
                        pltpu.VMEM((B, 2 * Hp), jnp.float32)],
        compiler_params=pltpu.CompilerParams(
            dimension_semantics=("arbitrary",)),
    )(gx_tbg, lens.reshape(B, 1).astype(jnp.int32), whh_bf16)
    return o_f, o_b


def _pad_gate_cols(w, H, Hp):
    """Pad each of the 4 PyTorch gate blocks (i,f,g,o) from width H to Hp."""
    r = w.shape[0]
    w4 = w.reshape(r, 4, H)
    return jnp.pad(w4, ((0, 0), (0, 0), (0, Hp - H))).reshape(r, 4 * Hp)


# ----------------------------- module forwards ----------------------------- #

def bert_encoding_forward(params, bert_token, bert_segment):
    # TODO(synk): external pretrained BERT replaced by a deterministic
    # embedding lookup producing the (B, S, bert_size) encoder activations.
    enc = params['bert_emb'][bert_token]                 # (B, S, bert_size)
    B, S = bert_segment.shape
    max_segment_len = jnp.argmax(bert_segment, axis=-1, keepdims=True)  # (B,1)
    batch_arrange = jnp.arange(S)[None, :]
    segment_mask = batch_arrange <= max_segment_len
    sentence_mask = segment_mask & (bert_segment == 0)
    sentence_lens = sentence_mask.astype(jnp.int32).sum(axis=1, keepdims=True)
    # Host read mirrors the reference's `.item()`; eager-only (bucket / pass a
    # static max_len to run this under jax.jit).
    max_len = int(jnp.max(sentence_lens))
    sentence = enc[:, :max_len]
    smask = sentence_mask[:, :max_len]
    bert_size = sentence.shape[-1]
    hidden_size = params['w_st'].shape[1]
    out = masked_linear(sentence.reshape(B * max_len, bert_size),
                        smask.reshape(B * max_len, 1).astype(jnp.float32),
                        params['w_st'], params['b_st'])
    # nn.Dropout -> identity at inference
    return out.reshape(B, max_len, hidden_size)


def bilstm_forward(params, inputs_btd, bert_segment, hidden_dim, layers):
    # Sort by descending segment-argmax length (packed-sequence semantics);
    # the reference returns the sorted-order output without unsorting.
    B, T, _ = inputs_btd.shape
    H = hidden_dim // 2
    Hp = _round_up(H, _LANE)

    max_segment_len = jnp.argmax(bert_segment, axis=-1).reshape(-1)
    idx1 = jnp.argsort(-max_segment_len)
    seq_lengths = max_segment_len[idx1]
    x = inputs_btd[idx1]
    lens = jnp.minimum(seq_lengths, T).astype(jnp.int32)

    # Transpose once to time-major for the whole stack; pad batch to 8 rows.
    Bp = _round_up(B, _SUBLANE)
    x_tbd = jnp.transpose(x, (1, 0, 2))                  # (T, B, Din)
    x_tbd = jnp.pad(x_tbd, ((0, 0), (0, Bp - B), (0, 0)))
    lens_p = jnp.pad(lens, (0, Bp - B))                  # pad rows -> len 0

    layer_in = x_tbd                                     # (T, Bp, Din)
    for l in range(layers):
        p = params['lstm'][l]
        # Combined, gate-padded input projection weights: (Din, 8*Hp)
        wih = jnp.concatenate([_pad_gate_cols(p['wih_f'], H, Hp),
                               _pad_gate_cols(p['wih_b'], H, Hp)], axis=1)
        bias = jnp.concatenate(
            [_pad_gate_cols(p['b_f'].reshape(1, -1), H, Hp).ravel(),
             _pad_gate_cols(p['b_b'].reshape(1, -1), H, Hp).ravel()])
        # Block-diagonal recurrent weights: (2*Hp, 8*Hp)
        whh_f = jnp.pad(_pad_gate_cols(p['whh_f'], H, Hp), ((0, Hp - H), (0, 0)))
        whh_b = jnp.pad(_pad_gate_cols(p['whh_b'], H, Hp), ((0, Hp - H), (0, 0)))
        z = jnp.zeros((Hp, 4 * Hp), jnp.float32)
        whh = jnp.concatenate(
            [jnp.concatenate([whh_f, z], axis=1),
             jnp.concatenate([z, whh_b], axis=1)], axis=0)

        Tt, Bb, Din = layer_in.shape
        # Input projection for all timesteps & both directions in one matmul.
        gx = linear(layer_in.reshape(Tt * Bb, Din), wih, bias)  # (T*Bp, 8Hp)
        gx = gx.reshape(Tt, Bb, 8 * Hp)
        o_f, o_b = _bilstm_rec(gx, lens_p, whh.astype(jnp.bfloat16), Hp)
        layer_in = jnp.concatenate([o_f[:, :, :H], o_b[:, :, :H]], axis=-1)

    out = jnp.transpose(layer_in[:, :B], (1, 0, 2))      # (B, T, hidden_dim)
    # Host read mirrors pad_packed_sequence's max length; eager-only.
    t_out = int(jnp.max(lens))
    return out[:, :t_out]


def bert_rnn_forward(params, bert_token, bert_segment, hidden_dim, layers):
    bertout = bert_encoding_forward(params, bert_token, bert_segment)
    out = bilstm_forward(params, bertout, bert_segment, hidden_dim, layers)
    B, T, D = out.shape
    num_cat = params['w_out'].shape[1]
    logits = linear(out.reshape(B * T, D), params['w_out'], params['b_out'])
    return logits.reshape(B, T, num_cat)


# ------------------------------- parameters -------------------------------- #

def init_params(key, vocab, bert_size, hidden_size, hidden_dim, layers,
                num_categories):
    H = hidden_dim // 2
    params = {}
    params['bert_emb'] = jax.random.normal(
        jax.random.fold_in(key, 0), (vocab, bert_size), jnp.float32) * 0.1
    params['w_st'] = jax.random.normal(
        jax.random.fold_in(key, 1), (bert_size, hidden_size),
        jnp.float32) * (1.0 / math.sqrt(bert_size))
    params['b_st'] = jnp.zeros((hidden_size,), jnp.float32)

    # BiLSTM init_weight(): biases 0; l0 weights ~ N(0, sqrt(2/(input_dim*2))),
    # deeper layers ~ N(0, sqrt(2/(input_dim*3))), input_dim == hidden_size.
    stdv = math.sqrt(2.0 / (hidden_size * 2))
    stdv_1 = math.sqrt(2.0 / (hidden_size * 3))
    lstm_params = []
    k = 10
    for l in range(layers):
        din = hidden_size if l == 0 else hidden_dim
        std = stdv if l == 0 else stdv_1
        layer = {}
        for d in ('f', 'b'):
            layer['wih_' + d] = jax.random.normal(
                jax.random.fold_in(key, k), (din, 4 * H), jnp.float32) * std
            k += 1
            layer['whh_' + d] = jax.random.normal(
                jax.random.fold_in(key, k), (H, 4 * H), jnp.float32) * std
            k += 1
            # b_ih + b_hh, both zero-initialised (sum pretrained biases if
            # loading real PyTorch LSTM weights).
            layer['b_' + d] = jnp.zeros((4 * H,), jnp.float32)
        lstm_params.append(layer)
    params['lstm'] = lstm_params

    params['w_out'] = jax.random.normal(
        jax.random.fold_in(key, 2), (hidden_dim, num_categories),
        jnp.float32) * (1.0 / math.sqrt(hidden_dim))
    params['b_out'] = jnp.zeros((num_categories,), jnp.float32)
    return params


if __name__ == "__main__":
    key = jax.random.PRNGKey(0)
    B, S = 2, 16
    vocab = 32
    bert_size = 128
    hidden_size = 128     # BiLSTM input dim
    hidden_dim = 64       # -> H = 32 per direction (padded to 128 lanes)
    layers = 1
    num_categories = 5

    kp, kt = jax.random.split(key)
    params = init_params(kp, vocab, bert_size, hidden_size, hidden_dim,
                         layers, num_categories)

    bert_token = jax.random.randint(kt, (B, S), 0, vocab, dtype=jnp.int32)
    # canonical BERT segment ids: zeros over the sentence, ones afterwards
    sent_lens = [6, 9]
    bert_segment = jnp.stack(
        [(jnp.arange(S) >= l).astype(jnp.int32) for l in sent_lens])

    out = bert_rnn_forward(params, bert_token, bert_segment, hidden_dim, layers)
    jax.block_until_ready(out)
    assert out.shape == (B, 9, num_categories), out.shape
    assert bool(jnp.all(jnp.isfinite(out)))
    print("KERNEL_OK")
</pallas_src>

<mosaic_0001>
module attributes {stable_mosaic.version = 11 : i64} {
  func.func @_masked_linear_kernel(%arg0: i32, %arg1: memref<24x128xf32, #tpu.memory_space<vmem>>, %arg2: memref<24x1xf32, #tpu.memory_space<vmem>>, %arg3: memref<128x128xbf16, #tpu.memory_space<vmem>>, %arg4: memref<1x128xf32, #tpu.memory_space<vmem>>, %arg5: memref<24x128xf32, #tpu.memory_space<vmem>>) attributes {dimension_semantics = [#tpu.dimension_semantics<parallel>], iteration_bounds = array<i64: 1>, scalar_prefetch = 0 : i64, scratch_operands = 0 : i64, tpu.core_type = #tpu.core_type<tc>, window_params = [{transform_indices = @transform_0, window_bounds = array<i64: 24, 128>}, {transform_indices = @transform_1, window_bounds = array<i64: 24, 1>}, {pipeline_mode = #tpu.pipeline_mode<synchronous>, transform_indices = @transform_2, window_bounds = array<i64: 128, 128>}, {pipeline_mode = #tpu.pipeline_mode<synchronous>, transform_indices = @transform_3, window_bounds = array<i64: 1, 128>}, {transform_indices = @transform_4, window_bounds = array<i64: 24, 128>}]} {
    %c0 = arith.constant 0 : index
    %c0_0 = arith.constant 0 : index
    %0 = vector.load %arg1[%c0, %c0_0] : memref<24x128xf32, #tpu.memory_space<vmem>>, vector<24x128xf32>
    %c0_1 = arith.constant 0 : index
    %c0_2 = arith.constant 0 : index
    %1 = vector.load %arg2[%c0_1, %c0_2] : memref<24x1xf32, #tpu.memory_space<vmem>>, vector<24x1xf32>
    %2 = vector.broadcast %1 : vector<24x1xf32> to vector<24x128xf32>
    %3 = arith.mulf %0, %2 : vector<24x128xf32>
    %4 = arith.truncf %3 : vector<24x128xf32> to vector<24x128xbf16>
    %c0_3 = arith.constant 0 : index
    %c0_4 = arith.constant 0 : index
    %5 = vector.load %arg3[%c0_3, %c0_4] : memref<128x128xbf16, #tpu.memory_space<vmem>>, vector<128x128xbf16>
    %cst = arith.constant dense<0.000000e+00> : vector<24x128xf32>
    %6 = tpu.matmul %4, %5, %cst {dimension_numbers = #tpu.dot_dimension_numbers<[1], [0], [0], [1], [0, 0, 1, 1], [], []>} : vector<24x128xbf16>, vector<128x128xbf16>, vector<24x128xf32> -> vector<24x128xf32>
    %c0_5 = arith.constant 0 : index
    %c0_6 = arith.constant 0 : index
    %7 = vector.load %arg4[%c0_5, %c0_6] : memref<1x128xf32, #tpu.memory_space<vmem>>, vector<1x128xf32>
    %8 = vector.broadcast %7 : vector<1x128xf32> to vector<24x128xf32>
    %9 = arith.addf %6, %8 : vector<24x128xf32>
    %c0_7 = arith.constant 0 : index
    %c0_8 = arith.constant 0 : index
    %10 = vector.load %arg5[%c0_7, %c0_8] : memref<24x128xf32, #tpu.memory_space<vmem>>, vector<24x128xf32>
    tpu.vector_store %arg5[%c0_7, %c0_8], %9 {strides = array<i32>} : memref<24x128xf32, #tpu.memory_space<vmem>>, vector<24x128xf32>,
    return
  }
  func.func @transform_0(%arg0: i32) -> (i32, i32) {
    %c0_i32 = arith.constant 0 : i32
    %c0_i32_0 = arith.constant 0 : i32
    return %arg0, %c0_i32 : i32, i32
  }
  func.func @transform_1(%arg0: i32) -> (i32, i32) {
    %c0_i32 = arith.constant 0 : i32
    %c0_i32_0 = arith.constant 0 : i32
    return %arg0, %c0_i32 : i32, i32
  }
  func.func @transform_2(%arg0: i32) -> (i32, i32) {
    %c0_i32 = arith.constant 0 : i32
    %c0_i32_0 = arith.constant 0 : i32
    %c0_i32_1 = arith.constant 0 : i32
    return %c0_i32, %c0_i32_0 : i32, i32
  }
  func.func @transform_3(%arg0: i32) -> (i32, i32) {
    %c0_i32 = arith.constant 0 : i32
    %c0_i32_0 = arith.constant 0 : i32
    %c0_i32_1 = arith.constant 0 : i32
    return %c0_i32, %c0_i32_0 : i32, i32
  }
  func.func @transform_4(%arg0: i32) -> (i32, i32) {
    %c0_i32 = arith.constant 0 : i32
    %c0_i32_0 = arith.constant 0 : i32
    return %arg0, %c0_i32 : i32, i32
  }
}

</mosaic_0001>

<bundles_post_ra>
// kernel: tpu_custom_call.1
= control target key start
LH: loop header
LB: loop body
LE: loop exit
PB: predicated region body
PF: predicated region fallthrough
CT: control target
= control target key end

     0   :  { %9 = vsyncpa [#allocation3], 0  ;;  %s379_s0 = inlined_call_operand.vmem [shape: f32[24,128], index: 0, kind: input, shape index: {}]   ;;  %s380_s1 = inlined_call_operand.vmem [shape: f32[24,1], index: 1, kind: input, shape index: {}]   ;;  %s381_s2 = inlined_call_operand.hbm [shape: bf16[128,128], index: 2, kind: input, shape index: {}]   ;;  %s382_s3 = inlined_call_operand.vmem [shape: f32[1,128], index: 3, kind: input, shape index: {}]   ;;  %s383_s4 = inlined_call_operand.hbm [shape: f32[24,128], index: 4, kind: output, shape index: {}]  }
   0x1   :  { %10 = vsyncpa [#allocation4], 0  ;;  %s302_s15 = smov [#allocation2]   ;;  %s254_s19 = scalar_lea.hbm %s381_s2, 1024 }
   0x2   :  { %s20_s16 = sshll.u32 %s302_s15, 4  ;;  %p255_p0 = scmp.ne.s32.totalorder %s381_s2, %s254_s19  ;;  %s21_s16 = int_to_ptr.vmem [resolvable:$true] %s20_s16 }
   0x3   :  { %p258_p1 = scmp.lt.u32.totalorder %s254_s19, %s381_s2 }
   0x5   :  { %p260_p2 = pnand %p258_p1, %p255_p0 }
   0x7   :  { %263 = shalt.err (!%p260_p2)
}
   0x8   :  { %s264_s24 = scalar_lea.vmem %s21_s16, 1024  ;;  %p269_p4 = scmp.lt.s32.totalorder %s21_s16, %s21_s16 }
   0x9   :  { %p265_p3 = scmp.ne.s32.totalorder %s21_s16, %s264_s24  ;;  %p270_p5 = scmp.lt.s32.totalorder %s264_s24, %s264_s24 }
   0xb   :  { %p271_p6 = por %p270_p5, %p269_p4 }
   0xd   :  { %p272_p7 = pnand %p271_p6, %p265_p3 }
   0xf   :  { %275 = shalt.err (!%p272_p7)
}
  0x10   :  { %s303_s25 = smov 64   ;;  %s304_s26 = smov 4  }
  0x11   :  { %26 = dma.hbm_to_vmem [thread:$0]  %s381_s2, 1024, %s21_s16, [#allocation3], %s303_s25, %s303_s25, %s304_s26  }
  0x12   :  { %298 = dma.done.wait [#allocation3], 1024  }
  0x13   :  { %299 = vsyncadd [#allocation3], 4294966272  ;;  %v305_v0 = vmov 0   ;;  %v36_v1 = vld [vmem:[%s380_s1] sm:$0xff]  ;;  %v37_v2 = vld [vmem:[%s380_s1 + $0x8] sm:$0xff]  ;;  %s306_s15 = smov [#allocation5]  }
  0x14   :  { %244 = vset.pattern.permute.xlu0 %v305_v0  ;;  %245 = vset.pattern.permute.xlu1 %v305_v0  ;;  %v38_v3 = vld [vmem:[%s380_s1 + $0x10] sm:$0xff]  ;;  %v246_v4 = vld [vmem:[#allocation2] sm:$0xff]   ;;  %v247_v5 = vld [vmem:[#allocation2 + $0x8] sm:$0xff]   ;;  %s186_s16 = sshll.u32 %s306_s15, 4  ;;  %s187_s16 = int_to_ptr.vmem [resolvable:$true] %s186_s16 }
  0x15   :  { %41 = vperm.xlu0 %244, %v36_v1   ;;  %51 = vperm.xlu1 %245, %v38_v3   ;;  %v248_v6 = vld [vmem:[#allocation2 + $0x10] sm:$0xff]   ;;  %v249_v7 = vld [vmem:[#allocation2 + $0x18] sm:$0xff]   ;;  %v250_v8 = vld [vmem:[#allocation2 + $0x20] sm:$0xff]   ;;  %p281_p9 = scmp.lt.s32.totalorder %s187_s16, %s187_s16 }
  0x16   :  { %217 = vmatprep.subr.bf16.mxu0 %v246_v4  ;;  %v251_v9 = vld [vmem:[#allocation2 + $0x28] sm:$0xff]   ;;  %v252_v10 = vld [vmem:[#allocation2 + $0x30] sm:$0xff]   ;;  %v253_v11 = vld [vmem:[#allocation2 + $0x38] sm:$0xff]  }
  0x17   :  { %218 = vmatpush3.bf16.msra.mxu0 %v246_v4  ;;  %v35_v12 = vld [vmem:[%s379_s0 + $0x10] sm:$0xff]  ;;  %v33_v15 = vld [vmem:[%s379_s0] sm:$0xff]  ;;  %v34_v16 = vld [vmem:[%s379_s0 + $0x8] sm:$0xff]  ;;  %s276_s0 = scalar_lea.vmem %s187_s16, 384 }
  0x18   :  { %219 = vmatprep.subr.bf16.mxu0 %v247_v5  ;;  %v198_v23 = vld [vmem:[%s382_s3] ss:$0 sm:$0xff]  ;;  %p277_p8 = scmp.ne.s32.totalorder %s187_s16, %s276_s0  ;;  %p282_p10 = scmp.lt.s32.totalorder %s276_s0, %s276_s0 }
  0x19   :  { %46 = vperm.xlu0 %244, %v37_v2  }
  0x1a   :  { %p283_p11 = por %p282_p10, %p281_p9 }
  0x1b   :  { %220 = vmatpush3.bf16.msra.mxu0 %v247_v5 }
  0x1c   :  { %221 = vmatprep.subr.bf16.mxu0 %v248_v6  ;;  %p284_p12 = pnand %p283_p11, %p277_p8 }
  0x1f   :  { %222 = vmatpush3.bf16.msra.mxu0 %v248_v6 }
  0x20   :  { %223 = vmatprep.subr.bf16.mxu0 %v249_v7 }
  0x23   :  { %224 = vmatpush3.bf16.msra.mxu0 %v249_v7 }
  0x24   :  { %225 = vmatprep.subr.bf16.mxu0 %v250_v8 }
  0x27   :  { %226 = vmatpush3.bf16.msra.mxu0 %v250_v8 }
  0x28   :  { %227 = vmatprep.subr.bf16.mxu0 %v251_v9 }
  0x2b   :  { %228 = vmatpush3.bf16.msra.mxu0 %v251_v9 }
  0x2c   :  { %229 = vmatprep.subr.bf16.mxu0 %v252_v10 }
  0x2f   :  { %230 = vmatpush3.bf16.msra.mxu0 %v252_v10 }
  0x30   :  { %231 = vmatprep.subr.bf16.mxu0 %v253_v11 }
  0x33   :  { %232 = vmatpush3.bf16.msra.mxu0 %v253_v11 }
  0x94   :  { %v42_v13 = vpop.permute.xlu0 %41  ;;  %v52_v14 = vpop.permute.xlu1 %51 }
  0x95   :  { %v56_v17 = vmul.f32 %v52_v14, %v35_v12  ;;  %v54_v19 = vmul.f32 %v42_v13, %v33_v15 }
  0x97   :  { %v58_v21 = vpack.c.bf16 %v56_v17, %v56_v17 }
  0x98   :  { %v47_v18 = vpop.permute.xlu0 %46 }
  0x99   :  { %v55_v20 = vmul.f32 %v47_v18, %v34_v16 }
  0x9b   :  { %v57_v22 = vpack.c.bf16 %v55_v20, %v54_v19 }
  0x9d   :  { %233 = vmatprep.mubr.bf16.mxu0 %v57_v22 }
  0x9e   :  { %234 = vmatmul.mubr.bf16.vlgmr.msra.gmra.mrb[0].mxu0 %v58_v21 }
 0x171   :  { %v235_v24 = vpop.f32.mrb[0].mxu0 }
 0x172   :  { %v173_v25 = vadd.f32 %v235_v24, %v198_v23  ;;  %v164_v26 = vpop.f32.mrb[1].mxu0 }
 0x173   :  { %v165_v27 = vadd.f32 %v198_v23, %v164_v26  ;;  %v236_v28 = vpop.f32.mrb[2].mxu0 }
 0x174   :  { %180 = vst [vmem:[#allocation5 + $0x10] sm:$0xff] %v173_v25  ;;  %v167_v29 = vpop.f32.mrb[3].mxu0 }
 0x175   :  { %178 = vst [vmem:[#allocation5] sm:$0xff] %v165_v27  ;;  %v168_v30 = vadd.f32 %v198_v23, %v167_v29 }
 0x177   :  { %179 = vst [vmem:[#allocation5 + $0x8] sm:$0xff] %v168_v30 }
 0x178   :  { %287 = shalt.err (!%p284_p12)
}
 0x179   :  { %s288_s18 = scalar_lea.hbm %s383_s4, 384 }
 0x17a   :  { %p289_p13 = scmp.ne.s32.totalorder %s383_s4, %s288_s18  ;;  %p292_p0 = scmp.lt.u32.totalorder %s288_s18, %s383_s4 }
 0x17c   :  { %p294_p1 = pnand %p292_p0, %p289_p13 }
 0x17e   :  { %297 = shalt.err (!%p294_p1)
}
 0x17f   :  { %s307_s23 = smov 128   ;;  %s308_s24 = smov 8  }
 0x180   :  { %192 = dma.vmem_to_hbm [thread:$0]  %s187_s16, 384, %s383_s4, [#allocation4], %s307_s23, %s307_s23, %s308_s24  }
 0x181   :  { %300 = dma.done.wait [#allocation4], 384  }
 0x182   :  { %301 = vsyncadd [#allocation4], 4294966912 }
 0x183   :  { %196 = vsyncpa [#allocation3], 1 }
 0x184   :  { %197 = vsyncpa [#allocation4], 1 }

</bundles_post_ra>
